<compile_context>
chip_gen: v6e
topology: v6e:2x2x1
jax: 0.10.0
libtpu: 0.0.40
codegen_flags: <defaults>
</compile_context>

<pallas_src>
import jax
import jax.numpy as jnp
from jax import lax
from jax.experimental import pallas as pl
from jax.experimental.pallas import tpu as pltpu

EPS = 1e-5
_NSPLIT = 2  # stats-pass parallel split (uses both TensorCores on v7x)


def _vmem_limit_bytes():
    """Generation-aware scoped-VMEM limit (3/4 of physical, capped at 96 MiB)."""
    try:
        cap = int(pltpu.get_tpu_info().vmem_capacity_bytes)
    except Exception:
        cap = 64 * 1024 * 1024          # conservative fallback (v7x per-TC VMEM)
    return min((cap * 3) // 4, 96 * 1024 * 1024)


# --------------------------- pass 1: BN statistics ---------------------------

def bn_stats_kernel(x_ref, sum_ref, sumsq_ref):
    """Accumulate per-channel sum and sum-of-squares over this split's blocks."""
    @pl.when(pl.program_id(1) == 0)
    def _init():
        sum_ref[...] = jnp.zeros_like(sum_ref)
        sumsq_ref[...] = jnp.zeros_like(sumsq_ref)

    x = x_ref[...]                                     # (nb, C, L) f32
    xs = jnp.sum(x, axis=0)                            # (C, L)
    x2s = jnp.sum(x * x, axis=0)                       # (C, L)
    sum_ref[...] += jnp.sum(xs, axis=1, keepdims=True)[None]    # (1, C, 1)
    sumsq_ref[...] += jnp.sum(x2s, axis=1, keepdims=True)[None]  # (1, C, 1)


# ------------------- pass 2: folded conv + residual + ReLU -------------------

def conv_res_kernel(x_ref, w_ref, bias_ref, o_ref):
    nb, c, l = x_ref.shape
    mm = w_ref.dtype

    # Loaded once per grid step (tiny, VMEM-resident).
    w0 = w_ref[0]                                      # (C, C) BN-folded taps
    w1 = w_ref[1]
    w2 = w_ref[2]
    b_full = bias_ref[:, 0:1]                          # (C, 1) full bias
    corr_first = bias_ref[:, 1:2]                      # (C, 1) l = 0 correction
    corr_last = bias_ref[:, 2:3]                       # (C, 1) l = L-1 correction

    lane = lax.broadcasted_iota(jnp.int32, (1, l), 1)  # (1, L) -- not full-tile
    first = lane == 0
    last = lane == l - 1

    def body(i, carry):
        xi = x_ref[i]                                  # (C, L) f32
        xm = xi.astype(mm)                             # MXU operand dtype
        # Three plain 2-D matmuls; no broadcast weights, no batch dims.
        y0 = jnp.dot(w0, xm, preferred_element_type=jnp.float32)
        y1 = jnp.dot(w1, xm, preferred_element_type=jnp.float32)
        y2 = jnp.dot(w2, xm, preferred_element_type=jnp.float32)
        # Roll the tap *outputs* (commutes with the channel contraction);
        # boundary columns are zero (conv zero padding).
        out = y1 + jnp.where(first, 0.0, pltpu.roll(y0, 1, axis=1))
        out = out + jnp.where(last, 0.0, pltpu.roll(y2, l - 1, axis=1))
        out = out + b_full + xi                        # folded bias + residual
        out = out + jnp.where(first, corr_first, 0.0)
        out = out + jnp.where(last, corr_last, 0.0)
        o_ref[i] = jnp.maximum(out, 0.0)
        return carry

    lax.fori_loop(0, nb, body, 0)


# --------------------------------- wrapper -----------------------------------

def res_unit_forward(x, gamma, beta, w, b, *, matmul_dtype=jnp.float32,
                     max_n_block=None):
    """ReLU(Conv1d(BatchNorm1d(x)) + x) for x of shape (N, C, L).

    w: (C, C, 3) Conv1d weight, b: (C,) bias, gamma/beta: (C,) BN affine.
    matmul_dtype=jnp.bfloat16 casts only the MXU operands (recommended on all
    generations -- v5e/v6e/v7x MXUs are bf16-native); every elementwise op
    (stats, bias, residual, ReLU) stays in f32.
    max_n_block optionally caps the N-block size (testing / tuning).
    """
    n, c, l = x.shape
    vmem_limit = _vmem_limit_bytes()
    # ~4 tile-sized f32 buffers live (double-buffered in + out); /6 leaves
    # slack for weights, bias and per-sample temporaries.
    tile_budget = vmem_limit // 6
    per_sample = c * l * 4
    nb = max(1, min(n, tile_budget // max(per_sample, 1)))
    if max_n_block is not None:
        nb = max(1, min(nb, max_n_block))

    g2 = -(-n // nb)                                  # pass-2 grid size
    nsplit = _NSPLIT if g2 >= _NSPLIT else 1
    steps = -(-g2 // nsplit)
    g1 = steps * nsplit                               # pass-1 block count
    n_pad = g1 * nb
    x_pad = x if n_pad == n else jnp.pad(x, ((0, n_pad - n), (0, 0), (0, 0)))

    # ---- pass 1: per-channel sum / sumsq, per-split accumulators ----
    x_spec_p1 = pl.BlockSpec((nb, c, l), lambda p, s: (p * steps + s, 0, 0))
    s_parts, sq_parts = pl.pallas_call(
        bn_stats_kernel,
        out_shape=(jax.ShapeDtypeStruct((nsplit, c, 1), jnp.float32),
                   jax.ShapeDtypeStruct((nsplit, c, 1), jnp.float32)),
        grid_spec=pltpu.PrefetchScalarGridSpec(
            num_scalar_prefetch=0,
            grid=(nsplit, steps),
            in_specs=[x_spec_p1],
            out_specs=(pl.BlockSpec((1, c, 1), lambda p, s: (p, 0, 0)),
                       pl.BlockSpec((1, c, 1), lambda p, s: (p, 0, 0)))),
        compiler_params=pltpu.CompilerParams(
            dimension_semantics=("parallel", "arbitrary"),
            vmem_limit_bytes=vmem_limit),
        cost_estimate=pl.CostEstimate(
            flops=3 * n_pad * c * l, transcendentals=0,
            bytes_accessed=4 * n_pad * c * l),
    )(x_pad)

    # Padded rows are zero -> they add nothing; the mean uses the true count.
    count = float(n * l)
    s = jnp.sum(s_parts[:, :, 0], axis=0)                    # (C,)
    sq = jnp.sum(sq_parts[:, :, 0], axis=0)                  # (C,)
    mean = s / count
    # NOTE: single-pass E[x^2]-E[x]^2 (biased) -- fine for near-zero-mean radio
    # IQ data; a shifted two-pass form would be needed for large DC offsets.
    var = jnp.maximum(sq / count - mean * mean, 0.0)
    scale = gamma * lax.rsqrt(var + EPS)                     # (C,)
    shift = beta - mean * scale                              # (C,)

    # ---- fold BN into the conv (tiny (3, C, C) wrapper-side math) ----
    w_taps = jnp.transpose(w, (2, 0, 1))                     # (3, C_out, C_in)
    w_fold = (w_taps * scale[None, None, :]).astype(matmul_dtype)
    tap_bias = jnp.einsum('koi,i->ko', w_taps, shift)        # (3, C_out)
    b_full = b + tap_bias.sum(axis=0)                        # (C,)
    # (C, 3): [full bias | l=0 correction | l=L-1 correction] -- the zero-padded
    # sequence ends see y=0 rather than the BN shift.
    bias_cols = jnp.stack([b_full, -tap_bias[0], -tap_bias[2]],
                          axis=1).astype(jnp.float32)

    # ---- pass 2: tiled conv + residual + ReLU ----
    n_out = g2 * nb
    out = pl.pallas_call(
        conv_res_kernel,
        out_shape=jax.ShapeDtypeStruct((n_out, c, l), jnp.float32),
        grid_spec=pltpu.PrefetchScalarGridSpec(
            num_scalar_prefetch=0,
            grid=(g2,),
            in_specs=[pl.BlockSpec((nb, c, l), lambda i: (i, 0, 0)),
                      pl.BlockSpec((3, c, c), lambda i: (0, 0, 0)),
                      pl.BlockSpec((c, 3), lambda i: (0, 0))],
            out_specs=pl.BlockSpec((nb, c, l), lambda i: (i, 0, 0))),
        compiler_params=pltpu.CompilerParams(
            dimension_semantics=("parallel",),
            vmem_limit_bytes=vmem_limit),
        cost_estimate=pl.CostEstimate(
            flops=2 * 3 * c * c * n_out * l,
            transcendentals=0,
            bytes_accessed=2 * 4 * n_out * c * l + 4 * 3 * c * c),
    )(x_pad, w_fold, bias_cols)

    return out if n_out == n else out[:n]


def res_unit_reference(x_ncl, gamma, beta, w, b):
    """Plain-JAX reference of ReLU(Conv1d(BN(x)) + x)."""
    mean = jnp.mean(x_ncl, axis=(0, 2), keepdims=True)
    var = jnp.mean((x_ncl - mean) ** 2, axis=(0, 2), keepdims=True)
    y = (x_ncl - mean) / jnp.sqrt(var + EPS) * gamma[None, :, None] + beta[None, :, None]
    out = lax.conv_general_dilated(
        y, w, window_strides=(1,), padding=((1, 1),),
        dimension_numbers=("NCH", "OIH", "NCH"))
    out = out + b[None, :, None] + x_ncl
    return jnp.maximum(out, 0.0)


def _make_params(key, c):
    kg, kb, kw, kbi = jax.random.split(key, 4)
    gamma = 1.0 + 0.1 * jax.random.normal(kg, (c,), dtype=jnp.float32)
    beta = 0.1 * jax.random.normal(kb, (c,), dtype=jnp.float32)
    bound = 1.0 / (c * 3.0) ** 0.5
    w = jax.random.uniform(kw, (c, c, 3), minval=-bound, maxval=bound,
                           dtype=jnp.float32)
    b = jax.random.uniform(kbi, (c,), minval=-bound, maxval=bound,
                           dtype=jnp.float32)
    return gamma, beta, w, b


if __name__ == "__main__":
    key = jax.random.PRNGKey(0)
    kx1, kp1, kx2, kp2 = jax.random.split(key, 4)

    # --- small shape consistent with the module: (N, C, L) = (2, 4, 16) ---
    N, C, L = 2, 4, 16
    x = jax.random.normal(kx1, (N, C, L), dtype=jnp.float32)
    # conv2-branch parameters (conv1's result is discarded by the original
    # forward, so its parameters do not affect the output).
    gamma, beta, w, b = _make_params(kp1, C)

    ref = jax.block_until_ready(res_unit_reference(x, gamma, beta, w, b))

    # f32 MXU operands: matches the PyTorch module numerics.
    out = jax.block_until_ready(res_unit_forward(x, gamma, beta, w, b))
    assert out.shape == (N, C, L)
    assert jnp.allclose(out, ref, atol=1e-4, rtol=1e-4), "f32 mismatch vs reference"

    # bf16 MXU operands (recommended on v5e/v6e/v7x); elementwise math stays f32.
    out_bf16 = jax.block_until_ready(
        res_unit_forward(x, gamma, beta, w, b, matmul_dtype=jnp.bfloat16))
    assert jnp.allclose(out_bf16, ref, atol=5e-2, rtol=5e-2), "bf16 mismatch vs reference"

    # --- awkward N: exercises N zero-padding, multi-block pass 2 and the
    #     split (parallel-axis) stats accumulators ---
    N2, C2, L2 = 5, 8, 128
    x2 = jax.random.normal(kx2, (N2, C2, L2), dtype=jnp.float32)
    gamma2, beta2, w2, b2 = _make_params(kp2, C2)
    ref2 = jax.block_until_ready(res_unit_reference(x2, gamma2, beta2, w2, b2))
    out2 = jax.block_until_ready(
        res_unit_forward(x2, gamma2, beta2, w2, b2, max_n_block=2))
    assert out2.shape == (N2, C2, L2)
    assert jnp.allclose(out2, ref2, atol=1e-4, rtol=1e-4), "padded-N mismatch vs reference"

    print("KERNEL_OK")
</pallas_src>

<mosaic_0001>
module attributes {stable_mosaic.version = 11 : i64} {
  func.func @bn_stats_kernel(%arg0: i32, %arg1: i32, %arg2: memref<2x4x16xf32, #tpu.memory_space<vmem>>, %arg3: memref<1x4x1xf32, #tpu.memory_space<vmem>>, %arg4: memref<1x4x1xf32, #tpu.memory_space<vmem>>) attributes {dimension_semantics = [#tpu.dimension_semantics<parallel>, #tpu.dimension_semantics<arbitrary>], iteration_bounds = array<i64: 1, 1>, scalar_prefetch = 0 : i64, scratch_operands = 0 : i64, tpu.core_type = #tpu.core_type<tc>, window_params = [{transform_indices = @transform_0, window_bounds = array<i64: 2, 4, 16>}, {transform_indices = @transform_1, window_bounds = array<i64: 1, 4, 1>}, {transform_indices = @transform_2, window_bounds = array<i64: 1, 4, 1>}]} {
    %c0_i32 = arith.constant 0 : i32
    %0 = arith.cmpi eq, %arg1, %c0_i32 : i32
    %1 = arith.extui %0 : i1 to i32
    %c0_i32_0 = arith.constant 0 : i32
    %2 = arith.cmpi ne, %1, %c0_i32_0 : i32
    scf.if %2 {
      %cst_18 = arith.constant 0.000000e+00 : f32
      %19 = vector.broadcast %cst_18 : f32 to vector<1x4x1xf32>
      %c0_19 = arith.constant 0 : index
      %c0_20 = arith.constant 0 : index
      %c0_21 = arith.constant 0 : index
      %20 = vector.load %arg3[%c0_19, %c0_20, %c0_21] : memref<1x4x1xf32, #tpu.memory_space<vmem>>, vector<1x4x1xf32>
      tpu.vector_store %arg3[%c0_19, %c0_20, %c0_21], %19 {strides = array<i32>} : memref<1x4x1xf32, #tpu.memory_space<vmem>>, vector<1x4x1xf32>,
      %cst_22 = arith.constant 0.000000e+00 : f32
      %21 = vector.broadcast %cst_22 : f32 to vector<1x4x1xf32>
      %c0_23 = arith.constant 0 : index
      %c0_24 = arith.constant 0 : index
      %c0_25 = arith.constant 0 : index
      %22 = vector.load %arg4[%c0_23, %c0_24, %c0_25] : memref<1x4x1xf32, #tpu.memory_space<vmem>>, vector<1x4x1xf32>
      tpu.vector_store %arg4[%c0_23, %c0_24, %c0_25], %21 {strides = array<i32>} : memref<1x4x1xf32, #tpu.memory_space<vmem>>, vector<1x4x1xf32>,
    } else {
    }
    %c0 = arith.constant 0 : index
    %c0_1 = arith.constant 0 : index
    %c0_2 = arith.constant 0 : index
    %3 = vector.load %arg2[%c0, %c0_1, %c0_2] : memref<2x4x16xf32, #tpu.memory_space<vmem>>, vector<2x4x16xf32>
    %cst = arith.constant dense<0.000000e+00> : vector<4x16xf32>
    %4 = vector.multi_reduction <add>, %3, %cst [0] : vector<2x4x16xf32> to vector<4x16xf32>
    %5 = arith.mulf %3, %3 : vector<2x4x16xf32>
    %cst_3 = arith.constant dense<0.000000e+00> : vector<4x16xf32>
    %6 = vector.multi_reduction <add>, %5, %cst_3 [0] : vector<2x4x16xf32> to vector<4x16xf32>
    %c0_4 = arith.constant 0 : index
    %c0_5 = arith.constant 0 : index
    %c0_6 = arith.constant 0 : index
    %7 = vector.load %arg3[%c0_4, %c0_5, %c0_6] : memref<1x4x1xf32, #tpu.memory_space<vmem>>, vector<1x4x1xf32>
    %cst_7 = arith.constant dense<0.000000e+00> : vector<4xf32>
    %8 = vector.multi_reduction <add>, %4, %cst_7 [1] : vector<4x16xf32> to vector<4xf32>
    %9 = vector.shape_cast %8 : vector<4xf32> to vector<4x1xf32>
    %10 = vector.shape_cast %9 : vector<4x1xf32> to vector<1x4x1xf32>
    %11 = arith.addf %7, %10 : vector<1x4x1xf32>
    %c0_8 = arith.constant 0 : index
    %c0_9 = arith.constant 0 : index
    %c0_10 = arith.constant 0 : index
    %12 = vector.load %arg3[%c0_8, %c0_9, %c0_10] : memref<1x4x1xf32, #tpu.memory_space<vmem>>, vector<1x4x1xf32>
    tpu.vector_store %arg3[%c0_8, %c0_9, %c0_10], %11 {strides = array<i32>} : memref<1x4x1xf32, #tpu.memory_space<vmem>>, vector<1x4x1xf32>,
    %c0_11 = arith.constant 0 : index
    %c0_12 = arith.constant 0 : index
    %c0_13 = arith.constant 0 : index
    %13 = vector.load %arg4[%c0_11, %c0_12, %c0_13] : memref<1x4x1xf32, #tpu.memory_space<vmem>>, vector<1x4x1xf32>
    %cst_14 = arith.constant dense<0.000000e+00> : vector<4xf32>
    %14 = vector.multi_reduction <add>, %6, %cst_14 [1] : vector<4x16xf32> to vector<4xf32>
    %15 = vector.shape_cast %14 : vector<4xf32> to vector<4x1xf32>
    %16 = vector.shape_cast %15 : vector<4x1xf32> to vector<1x4x1xf32>
    %17 = arith.addf %13, %16 : vector<1x4x1xf32>
    %c0_15 = arith.constant 0 : index
    %c0_16 = arith.constant 0 : index
    %c0_17 = arith.constant 0 : index
    %18 = vector.load %arg4[%c0_15, %c0_16, %c0_17] : memref<1x4x1xf32, #tpu.memory_space<vmem>>, vector<1x4x1xf32>
    tpu.vector_store %arg4[%c0_15, %c0_16, %c0_17], %17 {strides = array<i32>} : memref<1x4x1xf32, #tpu.memory_space<vmem>>, vector<1x4x1xf32>,
    return
  }
  func.func @transform_0(%arg0: i32, %arg1: i32) -> (i32, i32, i32) {
    %c1_i32 = arith.constant 1 : i32
    %0 = arith.muli %arg0, %c1_i32 : i32
    %1 = arith.addi %0, %arg1 : i32
    %c0_i32 = arith.constant 0 : i32
    %c0_i32_0 = arith.constant 0 : i32
    %c0_i32_1 = arith.constant 0 : i32
    return %1, %c0_i32, %c0_i32_0 : i32, i32, i32
  }
  func.func @transform_1(%arg0: i32, %arg1: i32) -> (i32, i32, i32) {
    %c0_i32 = arith.constant 0 : i32
    %c0_i32_0 = arith.constant 0 : i32
    %c0_i32_1 = arith.constant 0 : i32
    return %arg0, %c0_i32, %c0_i32_0 : i32, i32, i32
  }
  func.func @transform_2(%arg0: i32, %arg1: i32) -> (i32, i32, i32) {
    %c0_i32 = arith.constant 0 : i32
    %c0_i32_0 = arith.constant 0 : i32
    %c0_i32_1 = arith.constant 0 : i32
    return %arg0, %c0_i32, %c0_i32_0 : i32, i32, i32
  }
}

</mosaic_0001>

<bundles_post_ra>
// kernel: tpu_custom_call.1
= control target key start
LH: loop header
LB: loop body
LE: loop exit
PB: predicated region body
PF: predicated region fallthrough
CT: control target
= control target key end

     0   :  { %8 = vsyncpa [#allocation3], 0  ;;  %s96_s9 = smov [#allocation2]   ;;  %s140_s0 = inlined_call_operand.hbm [shape: f32[2,4,16], index: 0, kind: input, shape index: {}]   ;;  %s141_s1 = inlined_call_operand.vmem [shape: f32[1,4,1], index: 1, kind: output, shape index: {0}]   ;;  %s142_s2 = inlined_call_operand.vmem [shape: f32[1,4,1], index: 2, kind: output, shape index: {1}]  }
   0x1   :  { %s18_s10 = sshll.u32 %s96_s9, 4  ;;  %s19_s10 = int_to_ptr.vmem [resolvable:$true] %s18_s10 }
   0x2   :  { %s82_s11 = scalar_lea.vmem %s19_s10, 128  ;;  %p87_p1 = scmp.lt.s32.totalorder %s19_s10, %s19_s10 }
   0x3   :  { %p83_p0 = scmp.ne.s32.totalorder %s19_s10, %s82_s11  ;;  %p88_p2 = scmp.lt.s32.totalorder %s82_s11, %s82_s11 }
   0x5   :  { %p89_p3 = por %p88_p2, %p87_p1 }
   0x7   :  { %p90_p4 = pnand %p89_p3, %p83_p0 }
   0x9   :  { %93 = shalt.err (!%p90_p4)
}
   0xa   :  { %s97_s12 = smov 64   ;;  %s98_s13 = smov 4  }
   0xb   :  { %24 = dma.hbm_to_vmem [thread:$0]  %s140_s0, 128, %s19_s10, [#allocation3], %s97_s12, %s97_s12, %s98_s13  }
   0xc   :  { %94 = dma.done.wait [#allocation3], 128  }
   0xd   :  { %95 = vsyncadd [#allocation3], 4294967168  ;;  %vm34_vm0 = vcmask 3072   ;;  %v99_v0 = vmov 0.0   ;;  %vm39_vm1 = vcmask 125952  }
   0xe   :  { %35 = vst.msk [vmem:[%s141_s1] sm:$0xf] %vm34_vm0, %v99_v0  ;;  %36 = vst.msk [vmem:[%s142_s2] sm:$0xf] %vm34_vm0, %v99_v0  ;;  %v37_v1 = vld [vmem:[#allocation2] sm:$0xf] }
   0xf   :  { %v38_v2 = vld [vmem:[#allocation2 + $0x4] sm:$0xf]  ;;  %v40_v3 = vsel %vm39_vm1, %v37_v1, 0.0  ;;  %v43_v5 = vmul.f32 %v37_v1, %v37_v1 }
  0x10   :  { %v41_v4 = vsel %vm39_vm1, %v38_v2, 0.0  ;;  %v44_v6 = vmul.f32 %v38_v2, %v38_v2 }
  0x11   :  { %v42_v7 = vadd.f32 %v41_v4, %v40_v3  ;;  %v45_v8 = vsel %vm39_vm1, %v43_v5, 0.0 }
  0x12   :  { %v46_v9 = vsel %vm39_vm1, %v44_v6, 0.0 }
  0x13   :  { %v49_v10 = vsel %vm39_vm1, %v42_v7, 0.0  ;;  %v47_v11 = vadd.f32 %v46_v9, %v45_v8 }
  0x14   :  { %50 = vadd.xlane.f32.xlu0 %v49_v10 }
  0x15   :  { %v56_v12 = vsel %vm39_vm1, %v47_v11, 0.0  ;;  %v48_v13 = vld [vmem:[%s141_s1] sm:$0xf] }
  0x16   :  { %v55_v16 = vld [vmem:[%s142_s2] sm:$0xf] }
  0x18   :  { %57 = vadd.xlane.f32.xlu0 %v56_v12 }
  0x9d   :  { %v51_v14 = vpop.xlane.xlu0 %50 }
  0x9e   :  { %v52_v15 = vadd.f32 %v51_v14, %v48_v13 }
  0xa0   :  { %54 = vst.msk [vmem:[%s141_s1] sm:$0xf] %vm34_vm0, %v52_v15 }
  0xa1   :  { %v58_v17 = vpop.xlane.xlu0 %57 }
  0xa2   :  { %v59_v18 = vadd.f32 %v58_v17, %v55_v16 }
  0xa4   :  { %60 = vst.msk [vmem:[%s142_s2] sm:$0xf] %vm34_vm0, %v59_v18 }
  0xa5   :  { %69 = vsyncpa [#allocation3], 1 }

</bundles_post_ra>
